<compile_context>
chip_gen: v6e
topology: v6e:2x2x1
jax: 0.10.0
libtpu: 0.0.40
codegen_flags: <defaults>
</compile_context>

<pallas_src>
import jax
import jax.numpy as jnp
from jax.experimental import pallas as pl
from jax.experimental.pallas import tpu as pltpu


def _round_up(x, m):
    return ((x + m - 1) // m) * m


# ------------------------------ Pallas kernel ------------------------------

def _conv1x1_kernel(x_ref, w_ref, b_ref, o_ref):
    """One (batch, HW-tile) block of the 1x1-conv GEMM in native NCHW layout.

    x_ref: (Cin,  THW)  f32 activations for one image, one spatial tile
    w_ref: (CoutP, Cin) f32 weights, Cout zero-padded to a multiple of 8
    b_ref: (CoutP, 1)   f32 bias (zero-padded), lane-broadcast in the add
    o_ref: (CoutP, THW) f32 output tile (lane axis = spatial, dense)
    """
    o_ref[...] = (
        jnp.dot(w_ref[...], x_ref[...], preferred_element_type=jnp.float32)
        + b_ref[...]
    )


# ------------------------------ wrapper (NCHW) ------------------------------

def out_conv(x_nchw, w_oihw, bias, *, thw=8192):
    """PyTorch-style OutConv: nn.Conv2d(in_channels, out_channels, kernel_size=1).

    x_nchw: (N, Cin, H, W) float32
    w_oihw: (Cout, Cin, 1, 1) float32   (PyTorch Conv2d weight layout)
    bias:   (Cout,) float32
    returns (N, Cout, H, W) float32
    """
    n, cin, h, wd = x_nchw.shape
    cout = w_oihw.shape[0]
    hw = h * wd
    cout_p = _round_up(cout, 8)            # pad to 8 sublanes only (not 128 lanes)

    # Spatial tile: large (amortize per-grid-step overhead), lane-aligned (128),
    # and keep >= 2 total grid steps so both v7x TensorCores get work.
    thw = min(thw, _round_up(hw, 128))
    if n * pl.cdiv(hw, thw) < 2 and thw % 256 == 0:
        thw //= 2
    hw_pad = _round_up(hw, thw)

    # (N, Cin, H, W) -> (N, Cin, H*W): pure reshape, no data movement.
    x3 = x_nchw.reshape(n, cin, hw)
    if hw_pad != hw:
        x3 = jnp.pad(x3, ((0, 0), (0, 0), (0, hw_pad - hw)))

    # (Cout, Cin, 1, 1) -> (CoutP, Cin); bias -> (CoutP, 1).  Everything f32.
    w2 = jnp.pad(w_oihw[:, :, 0, 0], ((0, cout_p - cout), (0, 0)))
    b2 = jnp.pad(bias, (0, cout_p - cout)).reshape(cout_p, 1)

    out = pl.pallas_call(
        _conv1x1_kernel,
        out_shape=jax.ShapeDtypeStruct((n, cout_p, hw_pad), jnp.float32),
        grid=(n, hw_pad // thw),
        in_specs=[
            pl.BlockSpec((None, cin, thw), lambda b, j: (b, 0, j)),
            # Weight/bias index_maps are constant, so Pallas fetches them once;
            # pl.Buffered(1) would also free their spare VMEM buffer but is
            # negligible at these sizes.
            pl.BlockSpec((cout_p, cin), lambda b, j: (0, 0)),
            pl.BlockSpec((cout_p, 1), lambda b, j: (0, 0)),
        ],
        out_specs=pl.BlockSpec((None, cout_p, thw), lambda b, j: (b, 0, j)),
        compiler_params=pltpu.CompilerParams(
            dimension_semantics=("parallel", "parallel")),   # megacore sharding
    )(x3, w2, b2)

    # Drop channel / spatial padding (no-op when cout%8==0 and hw%thw==0).
    return out[:, :cout, :hw].reshape(n, cout, h, wd)


# ----------------------------------- test -----------------------------------

if __name__ == "__main__":
    key = jax.random.PRNGKey(0)
    kw, kb, kx = jax.random.split(key, 3)

    in_channels, out_channels = 64, 3              # UNet OutConv-style shapes
    n, h, wd = 2, 16, 16

    w = (jax.random.normal(kw, (out_channels, in_channels, 1, 1), jnp.float32)
         / jnp.sqrt(jnp.float32(in_channels)))
    b = 0.1 * jax.random.normal(kb, (out_channels,), jnp.float32)
    x = jax.random.normal(kx, (n, in_channels, h, wd), jnp.float32)

    y = jax.jit(out_conv)(x, w, b)
    jax.block_until_ready(y)

    assert y.shape == (n, out_channels, h, wd), y.shape
    assert bool(jnp.all(jnp.isfinite(y)))

    # Full-precision reference (kernel is f32 end-to-end now -> tight tolerance).
    ref = jnp.einsum("nchw,oc->nohw", x, w[:, :, 0, 0]) + b.reshape(1, -1, 1, 1)
    assert bool(jnp.allclose(y, ref, rtol=1e-3, atol=1e-3)), float(
        jnp.max(jnp.abs(y - ref)))

    print("KERNEL_OK")
</pallas_src>

<mosaic_0001>
module attributes {stable_mosaic.version = 11 : i64} {
  func.func @_conv1x1_kernel(%arg0: i32, %arg1: i32, %arg2: memref<1x64x256xf32, #tpu.memory_space<vmem>>, %arg3: memref<8x64xf32, #tpu.memory_space<vmem>>, %arg4: memref<8x1xf32, #tpu.memory_space<vmem>>, %arg5: memref<1x8x256xf32, #tpu.memory_space<vmem>>) attributes {dimension_semantics = [#tpu.dimension_semantics<parallel>, #tpu.dimension_semantics<parallel>], iteration_bounds = array<i64: 2, 1>, scalar_prefetch = 0 : i64, scratch_operands = 0 : i64, tpu.core_type = #tpu.core_type<tc>, window_params = [{transform_indices = @transform_0, window_bounds = array<i64: 1, 64, 256>}, {pipeline_mode = #tpu.pipeline_mode<synchronous>, transform_indices = @transform_1, window_bounds = array<i64: 8, 64>}, {pipeline_mode = #tpu.pipeline_mode<synchronous>, transform_indices = @transform_2, window_bounds = array<i64: 8, 1>}, {transform_indices = @transform_3, window_bounds = array<i64: 1, 8, 256>}]} {
    %c0 = arith.constant 0 : index
    %c0_0 = arith.constant 0 : index
    %0 = vector.load %arg3[%c0, %c0_0] : memref<8x64xf32, #tpu.memory_space<vmem>>, vector<8x64xf32>
    %c0_1 = arith.constant 0 : index
    %c0_2 = arith.constant 0 : index
    %c0_3 = arith.constant 0 : index
    %1 = vector.load %arg2[%c0_1, %c0_2, %c0_3] : memref<1x64x256xf32, #tpu.memory_space<vmem>>, vector<1x64x256xf32>
    %2 = vector.shape_cast %1 : vector<1x64x256xf32> to vector<64x256xf32>
    %cst = arith.constant dense<0.000000e+00> : vector<8x256xf32>
    %3 = tpu.matmul %0, %2, %cst {dimension_numbers = #tpu.dot_dimension_numbers<[1], [0], [0], [1], [0, 0, 1, 1], [], []>} : vector<8x64xf32>, vector<64x256xf32>, vector<8x256xf32> -> vector<8x256xf32>
    %c0_4 = arith.constant 0 : index
    %c0_5 = arith.constant 0 : index
    %4 = vector.load %arg4[%c0_4, %c0_5] : memref<8x1xf32, #tpu.memory_space<vmem>>, vector<8x1xf32>
    %5 = vector.broadcast %4 : vector<8x1xf32> to vector<8x256xf32>
    %6 = arith.addf %3, %5 : vector<8x256xf32>
    %c0_6 = arith.constant 0 : index
    %c0_7 = arith.constant 0 : index
    %c0_8 = arith.constant 0 : index
    %7 = vector.load %arg5[%c0_6, %c0_7, %c0_8] : memref<1x8x256xf32, #tpu.memory_space<vmem>>, vector<1x8x256xf32>
    %8 = vector.shape_cast %7 : vector<1x8x256xf32> to vector<8x256xf32>
    %9 = vector.shape_cast %6 : vector<8x256xf32> to vector<1x8x256xf32>
    tpu.vector_store %arg5[%c0_6, %c0_7, %c0_8], %9 {strides = array<i32>} : memref<1x8x256xf32, #tpu.memory_space<vmem>>, vector<1x8x256xf32>,
    return
  }
  func.func @transform_0(%arg0: i32, %arg1: i32) -> (i32, i32, i32) {
    %c0_i32 = arith.constant 0 : i32
    %c0_i32_0 = arith.constant 0 : i32
    return %arg0, %c0_i32, %arg1 : i32, i32, i32
  }
  func.func @transform_1(%arg0: i32, %arg1: i32) -> (i32, i32) {
    %c0_i32 = arith.constant 0 : i32
    %c0_i32_0 = arith.constant 0 : i32
    %c0_i32_1 = arith.constant 0 : i32
    return %c0_i32, %c0_i32_0 : i32, i32
  }
  func.func @transform_2(%arg0: i32, %arg1: i32) -> (i32, i32) {
    %c0_i32 = arith.constant 0 : i32
    %c0_i32_0 = arith.constant 0 : i32
    %c0_i32_1 = arith.constant 0 : i32
    return %c0_i32, %c0_i32_0 : i32, i32
  }
  func.func @transform_3(%arg0: i32, %arg1: i32) -> (i32, i32, i32) {
    %c0_i32 = arith.constant 0 : i32
    %c0_i32_0 = arith.constant 0 : i32
    return %arg0, %c0_i32, %arg1 : i32, i32, i32
  }
}

</mosaic_0001>

<bundles_post_ra>
// kernel: out_conv.1
= control target key start
LH: loop header
LB: loop body
LE: loop exit
PB: predicated region body
PF: predicated region fallthrough
CT: control target
= control target key end

     0   :  { %s484_s12 = smov 0   ;;  %s486_s13 = smov 0   ;;  %s527_s0 = inlined_call_operand.vmem [shape: f32[2,64,256], index: 0, kind: input, shape index: {}]   ;;  %s528_s1 = inlined_call_operand.vmem [shape: f32[8,64], index: 1, kind: input, shape index: {}]   ;;  %s529_s2 = inlined_call_operand.vmem [shape: f32[8,1], index: 2, kind: input, shape index: {}]   ;;  %s530_s3 = inlined_call_operand.vmem [shape: f32[2,8,256], index: 3, kind: output, shape index: {}]  }
   0x1   :  { %s488_s14 = smov 0  }
   0x2 LB: > { %s25_s15 = sadd.s32 1, %s456_s13  ;;  %p401_p0 = scmp.ge.s32.totalorder %s460_s14, 1  ;;  %s460_s14 = sphi %s488_s14, %s13_s14   ;;  %s456_s13 = sphi %s486_s13, %s532_s13   ;;  %s452_s12 = sphi %s484_s12, %s531_s12  }
   0x3   : > { %p27_p1 = scmp.ge.s32.totalorder %s25_s15, 2  ;;  %p158_p2 = scmp.lt.s32.totalorder %s460_s14, 3 }
   0x5   : > { %s534_s15 = smov (%p27_p1, %s25_s15), 0  ;;  %p159_p3 = pnand %p401_p0, %p158_p2 }
   0x6   : > { %p191_p4 = scmp.lt.s32.totalorder (!%p159_p3), %s452_s12, 1 }
   0x7   : > { %162 = sbr.rel (%p159_p3) target bundleno = 230 (0xe6), region = 32 }
   0xc   : > { %v227_v0 = vld [vmem:[%s529_s2] sm:$0xff]  ;;  %v462_v1 = vmov 0.0   ;;  %v463_v2 = vmov 0   ;;  %s536_s12 = smov (!%p191_p4, %s452_s12), 1  ;;  %vm233_vm0 = vcmask 523264  }
   0xd   : > { %301 = vmatprep.mubr.f32.mxu0 %v462_v1  ;;  %437 = vset.pattern.permute.xlu0 %v463_v2  ;;  %s409_s18 = sshll.u32 %s536_s12, 7  ;;  %v210_v19 = vld [vmem:[%s528_s1] sm:$0xff]  ;;  %s410_s24 = sshll.u32 %s536_s12, 4 }
   0xe   : > { %230 = vperm.xlu0 %437, %v227_v0   ;;  %s198_s21 = scalar_lea.vmem %s527_s0, %s409_s18  ;;  %s208_s27 = scalar_lea.vmem %s530_s3, %s410_s24 }
   0xf   : > { %v226_v3 = vld [vmem:[%s198_s21 + $0x78] sm:$0xff]  ;;  %v225_v4 = vld [vmem:[%s198_s21 + $0x70] sm:$0xff]  ;;  %v224_v5 = vld [vmem:[%s198_s21 + $0x68] sm:$0xff] }
  0x10   : > { %253 = vmatprep.subr.mxu0 %v226_v3  ;;  %v223_v6 = vld [vmem:[%s198_s21 + $0x60] sm:$0xff]  ;;  %v222_v7 = vld [vmem:[%s198_s21 + $0x58] sm:$0xff]  ;;  %v221_v8 = vld [vmem:[%s198_s21 + $0x50] sm:$0xff] }
  0x11   : > { %254 = vmatpush1.msra.mxu0 %v225_v4  ;;  %v220_v9 = vld [vmem:[%s198_s21 + $0x48] sm:$0xff]  ;;  %v219_v10 = vld [vmem:[%s198_s21 + $0x40] sm:$0xff]  ;;  %v218_v11 = vld [vmem:[%s198_s21 + $0x38] sm:$0xff] }
  0x12   : > { %255 = vmatprep.subr.mxu0 %v224_v5  ;;  %v217_v12 = vld [vmem:[%s198_s21 + $0x30] sm:$0xff]  ;;  %v216_v13 = vld [vmem:[%s198_s21 + $0x28] sm:$0xff]  ;;  %v215_v14 = vld [vmem:[%s198_s21 + $0x20] sm:$0xff] }
  0x13   : > { %256 = vmatpush1.msra.mxu0 %v223_v6  ;;  %v214_v15 = vld [vmem:[%s198_s21 + $0x18] sm:$0xff]  ;;  %v213_v16 = vld [vmem:[%s198_s21 + $0x10] sm:$0xff]  ;;  %v212_v17 = vld [vmem:[%s198_s21 + $0x8] sm:$0xff] }
  0x14   : > { %257 = vmatprep.subr.mxu0 %v222_v7  ;;  %v211_v18 = vld [vmem:[%s198_s21] sm:$0xff] }
  0x15   : > { %258 = vmatpush1.msra.mxu0 %v221_v8 }
  0x16   : > { %259 = vmatprep.subr.mxu0 %v220_v9 }
  0x17   : > { %260 = vmatpush1.msra.mxu0 %v219_v10 }
  0x18   : > { %261 = vmatprep.subr.mxu0 %v218_v11 }
  0x19   : > { %262 = vmatpush1.msra.mxu0 %v217_v12 }
  0x1a   : > { %263 = vmatprep.subr.mxu0 %v216_v13 }
  0x1b   : > { %264 = vmatpush1.msra.mxu0 %v215_v14 }
  0x1c   : > { %265 = vmatprep.subr.mxu0 %v214_v15 }
  0x1d   : > { %266 = vmatpush1.msra.mxu0 %v213_v16 }
  0x1e   : > { %267 = vmatprep.subr.mxu0 %v212_v17 }
  0x1f   : > { %268 = vmatpush1.msra.mxu0 %v211_v18 }
  0x20   : > { %406 = vmatmul.mubr.msk.f32.vlgmr.msra.gmra.mxu0 %vm233_vm0, %v210_v19 }
  0x89   : > { %v231_v20 = vpop.permute.xlu0 %230 }
  0xe0   : > { %v303_v21 = vpop.f32.mrf.mxu0 }
  0xe1   : > { %v304_v22 = vadd.f32 %v303_v21, %v231_v20 }
  0xe2   : > { %v305_v23 = vpop.f32.mrf.mxu0 }
  0xe3   : > { %308 = vst [vmem:[%s208_s27] sm:$0xff] %v304_v22  ;;  %v306_v24 = vadd.f32 %v305_v23, %v231_v20 }
  0xe5   : > { %309 = vst [vmem:[%s208_s27 + $0x8] sm:$0xff] %v306_v24 }
  0xe6 PF: > { %s13_s14 = sadd.s32 1, %s460_s14   ;;  %s531_s12 = smov %s456_s13 }
  0xe7   : > { %p10_p5 = scmp.ge.s32.totalorder %s13_s14, 4   ;;  %s532_s13 = smov %s534_s15 }
  0xe9   :  { %12 = sbr.rel (!%p10_p5) target bundleno = 2 (0x2), region = 62 }

</bundles_post_ra>
